<compile_context>
chip_gen: v7x
topology: tpu7x:2x2x1
jax: 0.10.0
libtpu: 0.0.40
codegen_flags: <defaults>
</compile_context>

<pallas_src>
import jax
import jax.numpy as jnp
from jax.experimental import pallas as pl
from jax.experimental.pallas import tpu as pltpu


def _round_up(x, m):
    return (x + m - 1) // m * m


def siamese_head_kernel(hA_ref, hB_ref,
                        w1_ref, b1_ref,
                        w2_ref, b2_ref,
                        w3_ref, b3_ref,
                        out_ref,
                        z_ref):
    D = hA_ref.shape[-1]

    # fusion == 'cat': assemble the [tile_n, 2D] fused tile in VMEM scratch
    # with two vector copies, so layer 1 is ONE K=2D matmul (half the MXU
    # pushes of the previous split-K formulation) and no HBM concat exists.
    z_ref[:, :D] = hA_ref[...]
    z_ref[:, D:] = hB_ref[...]

    # Layer 1: bf16 MXU operands, f32 accumulate. Dropout = identity (eval).
    x = jnp.dot(z_ref[...], w1_ref[...],
                preferred_element_type=jnp.float32) + b1_ref[...]
    x = jnp.maximum(x, 0.0).astype(jnp.bfloat16)          # ReLU

    # Layer 2.
    x = jnp.dot(x, w2_ref[...],
                preferred_element_type=jnp.float32) + b2_ref[...]
    x = jnp.maximum(x, 0.0).astype(jnp.bfloat16)

    # Layer 3: narrow n_targets output (masked stores are tile_n/8 per tile).
    out = jnp.dot(x, w3_ref[...],
                  preferred_element_type=jnp.float32) + b3_ref[...]

    # out / out.norm(dim=-1).clamp(min=1e-7)
    # rsqrt of the clamped squared norm == divide by norm clamped at 1e-7.
    sumsq = jnp.sum(out * out, axis=-1, keepdims=True)
    inv_norm = jax.lax.rsqrt(jnp.maximum(sumsq, 1e-14))
    out_ref[...] = (out * inv_norm).astype(out_ref.dtype)


def siamese_pairwise(hA, hB, params, *, tile_n=512):
    """hA, hB: [N, D] encoder outputs. params: head weights (w_i: [in,out], b_i: [1,out])."""
    N, D = hA.shape
    w1, b1 = params["w1"], params["b1"]
    w2, b2 = params["w2"], params["b2"]
    w3, b3 = params["w3"], params["b3"]
    H1, H2 = w1.shape[1], w2.shape[1]
    n_targets = w3.shape[1]
    assert w1.shape[0] == 2 * D, "fusion='cat' expects w1 of shape [2*D, H1]"

    # bf16 MXU operands; biases stay f32 (added into the f32 accumulators).
    hA = hA.astype(jnp.bfloat16)
    hB = hB.astype(jnp.bfloat16)
    w1 = w1.astype(jnp.bfloat16)
    w2 = w2.astype(jnp.bfloat16)
    w3 = w3.astype(jnp.bfloat16)
    b1 = b1.astype(jnp.float32)
    b2 = b2.astype(jnp.float32)
    b3 = b3.astype(jnp.float32)

    # Batch tiling: multiple of 8 sublanes; no wrapper-side pad (Pallas masks
    # the ragged last block, discarded rows never reach HBM). Clamp so that
    # the grid has >= 2 steps whenever N allows it (keeps both v7x TCs busy).
    tile_n = max(8, min(tile_n, _round_up(-(-N // 2), 8)))
    grid = (pl.cdiv(N, tile_n),)

    act_spec = pl.BlockSpec((tile_n, D), lambda i: (i, 0))

    # Weights/biases are grid-invariant: constant index_map -> DMA'd once,
    # stay VMEM-resident across all batch tiles.
    def _resident(shape):
        return pl.BlockSpec(shape, lambda i: (0, 0))

    out = pl.pallas_call(
        siamese_head_kernel,
        out_shape=jax.ShapeDtypeStruct((N, n_targets), jnp.float32),
        grid=grid,
        in_specs=[
            act_spec,                         # hA
            act_spec,                         # hB
            _resident((2 * D, H1)),           # w1
            _resident((1, H1)),               # b1
            _resident((H1, H2)),              # w2
            _resident((1, H2)),               # b2
            _resident((H2, n_targets)),       # w3
            _resident((1, n_targets)),        # b3
        ],
        out_specs=pl.BlockSpec((tile_n, n_targets), lambda i: (i, 0)),
        scratch_shapes=[pltpu.VMEM((tile_n, 2 * D), jnp.bfloat16)],
        compiler_params=pltpu.CompilerParams(
            dimension_semantics=("parallel",)),   # batch axis -> both TCs on v7x
    )(hA, hB, w1, b1, w2, b2, w3, b3)

    return out


def init_params(key, D=32, head_hidden_dims=(256, 128), n_targets=2, fusion="cat"):
    """Deterministic synthetic head parameters (PyTorch Linear: y = x @ W.T + b).

    Weights are stored already transposed to [in, out] for the kernel."""
    if fusion == "cat":
        in_head = 2 * D
    elif fusion == "diff":
        in_head = 3 * D
    elif fusion in ("diff2", "symm"):
        in_head = 4 * D
    else:
        raise ValueError(fusion)

    dims = [in_head, *head_hidden_dims, n_targets]
    keys = jax.random.split(key, len(dims) - 1)
    params = {}
    for i, (din, dout) in enumerate(zip(dims[:-1], dims[1:]), start=1):
        bound = 1.0 / jnp.sqrt(jnp.float32(din))
        kw, kb = jax.random.split(keys[i - 1])
        params[f"w{i}"] = jax.random.uniform(
            kw, (din, dout), jnp.float32, minval=-bound, maxval=bound)
        # biases kept 2-D ([1, dout]) for a clean TPU sublane/lane layout
        params[f"b{i}"] = jax.random.uniform(
            kb, (1, dout), jnp.float32, minval=-bound, maxval=bound)
    return params


def reference(hA, hB, params):
    z = jnp.concatenate([hA, hB], axis=-1)
    x = jnp.maximum(z @ params["w1"] + params["b1"], 0.0)
    x = jnp.maximum(x @ params["w2"] + params["b2"], 0.0)
    out = x @ params["w3"] + params["b3"]
    norm = jnp.clip(jnp.linalg.norm(out, axis=-1, keepdims=True), 1e-7, None)
    return out / norm


if __name__ == "__main__":
    key = jax.random.PRNGKey(0)
    k_hA, k_hB, k_p = jax.random.split(key, 3)

    N, D = 8, 32                      # batch of graph pairs, encoder.out_dim
    hA = jax.random.normal(k_hA, (N, D), jnp.float32)
    hB = jax.random.normal(k_hB, (N, D), jnp.float32)
    params = init_params(k_p, D=D, head_hidden_dims=(256, 128), n_targets=2)

    out = siamese_pairwise(hA, hB, params)
    out = jax.block_until_ready(out)

    ref = reference(hA, hB, params)
    assert out.shape == (N, 2)
    # bf16 MXU operands (f32 accumulation): tolerance relaxed deliberately.
    assert jnp.allclose(out, ref, atol=5e-2, rtol=5e-2), (
        f"max abs err {jnp.max(jnp.abs(out - ref))}")

    print("KERNEL_OK")
</pallas_src>

<mosaic_0001>
module attributes {stable_mosaic.version = 11 : i64} {
  func.func @siamese_head_kernel(%arg0: i32, %arg1: memref<8x32xbf16, #tpu.memory_space<vmem>>, %arg2: memref<8x32xbf16, #tpu.memory_space<vmem>>, %arg3: memref<64x256xbf16, #tpu.memory_space<vmem>>, %arg4: memref<1x256xf32, #tpu.memory_space<vmem>>, %arg5: memref<256x128xbf16, #tpu.memory_space<vmem>>, %arg6: memref<1x128xf32, #tpu.memory_space<vmem>>, %arg7: memref<128x2xbf16, #tpu.memory_space<vmem>>, %arg8: memref<1x2xf32, #tpu.memory_space<vmem>>, %arg9: memref<8x2xf32, #tpu.memory_space<vmem>>, %arg10: memref<8x64xbf16, #tpu.memory_space<vmem>>) attributes {dimension_semantics = [#tpu.dimension_semantics<parallel>], iteration_bounds = array<i64: 1>, scalar_prefetch = 0 : i64, scratch_operands = 1 : i64, tpu.core_type = #tpu.core_type<tc>, window_params = [{transform_indices = @transform_0, window_bounds = array<i64: 8, 32>}, {transform_indices = @transform_1, window_bounds = array<i64: 8, 32>}, {pipeline_mode = #tpu.pipeline_mode<synchronous>, transform_indices = @transform_2, window_bounds = array<i64: 64, 256>}, {pipeline_mode = #tpu.pipeline_mode<synchronous>, transform_indices = @transform_3, window_bounds = array<i64: 1, 256>}, {pipeline_mode = #tpu.pipeline_mode<synchronous>, transform_indices = @transform_4, window_bounds = array<i64: 256, 128>}, {pipeline_mode = #tpu.pipeline_mode<synchronous>, transform_indices = @transform_5, window_bounds = array<i64: 1, 128>}, {pipeline_mode = #tpu.pipeline_mode<synchronous>, transform_indices = @transform_6, window_bounds = array<i64: 128, 2>}, {pipeline_mode = #tpu.pipeline_mode<synchronous>, transform_indices = @transform_7, window_bounds = array<i64: 1, 2>}, {transform_indices = @transform_8, window_bounds = array<i64: 8, 2>}]} {
    %c0 = arith.constant 0 : index
    %c0_0 = arith.constant 0 : index
    %0 = vector.load %arg1[%c0, %c0_0] : memref<8x32xbf16, #tpu.memory_space<vmem>>, vector<8x32xbf16>
    %c0_1 = arith.constant 0 : index
    %c0_2 = arith.constant 0 : index
    %1 = vector.load %arg10[%c0_1, %c0_2] : memref<8x64xbf16, #tpu.memory_space<vmem>>, vector<8x32xbf16>
    tpu.vector_store %arg10[%c0_1, %c0_2], %0 {strides = array<i32>} : memref<8x64xbf16, #tpu.memory_space<vmem>>, vector<8x32xbf16>,
    %c0_3 = arith.constant 0 : index
    %c0_4 = arith.constant 0 : index
    %2 = vector.load %arg2[%c0_3, %c0_4] : memref<8x32xbf16, #tpu.memory_space<vmem>>, vector<8x32xbf16>
    %c0_5 = arith.constant 0 : index
    %c32 = arith.constant 32 : index
    %3 = vector.load %arg10[%c0_5, %c32] : memref<8x64xbf16, #tpu.memory_space<vmem>>, vector<8x32xbf16>
    tpu.vector_store %arg10[%c0_5, %c32], %2 {strides = array<i32>} : memref<8x64xbf16, #tpu.memory_space<vmem>>, vector<8x32xbf16>,
    %c0_6 = arith.constant 0 : index
    %c0_7 = arith.constant 0 : index
    %4 = vector.load %arg10[%c0_6, %c0_7] : memref<8x64xbf16, #tpu.memory_space<vmem>>, vector<8x64xbf16>
    %c0_8 = arith.constant 0 : index
    %c0_9 = arith.constant 0 : index
    %5 = vector.load %arg3[%c0_8, %c0_9] : memref<64x256xbf16, #tpu.memory_space<vmem>>, vector<64x256xbf16>
    %cst = arith.constant dense<0.000000e+00> : vector<8x256xf32>
    %6 = tpu.matmul %4, %5, %cst {dimension_numbers = #tpu.dot_dimension_numbers<[1], [0], [0], [1], [0, 0, 1, 1], [], []>} : vector<8x64xbf16>, vector<64x256xbf16>, vector<8x256xf32> -> vector<8x256xf32>
    %c0_10 = arith.constant 0 : index
    %c0_11 = arith.constant 0 : index
    %7 = vector.load %arg4[%c0_10, %c0_11] : memref<1x256xf32, #tpu.memory_space<vmem>>, vector<1x256xf32>
    %8 = vector.broadcast %7 : vector<1x256xf32> to vector<8x256xf32>
    %9 = arith.addf %6, %8 : vector<8x256xf32>
    %cst_12 = arith.constant 0.000000e+00 : f32
    %10 = vector.broadcast %cst_12 : f32 to vector<8x256xf32>
    %11 = arith.maximumf %9, %10 : vector<8x256xf32>
    %12 = arith.truncf %11 : vector<8x256xf32> to vector<8x256xbf16>
    %c0_13 = arith.constant 0 : index
    %c0_14 = arith.constant 0 : index
    %13 = vector.load %arg5[%c0_13, %c0_14] : memref<256x128xbf16, #tpu.memory_space<vmem>>, vector<256x128xbf16>
    %cst_15 = arith.constant dense<0.000000e+00> : vector<8x128xf32>
    %14 = tpu.matmul %12, %13, %cst_15 {dimension_numbers = #tpu.dot_dimension_numbers<[1], [0], [0], [1], [0, 0, 1, 1], [], []>} : vector<8x256xbf16>, vector<256x128xbf16>, vector<8x128xf32> -> vector<8x128xf32>
    %c0_16 = arith.constant 0 : index
    %c0_17 = arith.constant 0 : index
    %15 = vector.load %arg6[%c0_16, %c0_17] : memref<1x128xf32, #tpu.memory_space<vmem>>, vector<1x128xf32>
    %16 = vector.broadcast %15 : vector<1x128xf32> to vector<8x128xf32>
    %17 = arith.addf %14, %16 : vector<8x128xf32>
    %cst_18 = arith.constant 0.000000e+00 : f32
    %18 = vector.broadcast %cst_18 : f32 to vector<8x128xf32>
    %19 = arith.maximumf %17, %18 : vector<8x128xf32>
    %20 = arith.truncf %19 : vector<8x128xf32> to vector<8x128xbf16>
    %c0_19 = arith.constant 0 : index
    %c0_20 = arith.constant 0 : index
    %21 = vector.load %arg7[%c0_19, %c0_20] : memref<128x2xbf16, #tpu.memory_space<vmem>>, vector<128x2xbf16>
    %cst_21 = arith.constant dense<0.000000e+00> : vector<8x2xf32>
    %22 = tpu.matmul %20, %21, %cst_21 {dimension_numbers = #tpu.dot_dimension_numbers<[1], [0], [0], [1], [0, 0, 1, 1], [], []>} : vector<8x128xbf16>, vector<128x2xbf16>, vector<8x2xf32> -> vector<8x2xf32>
    %c0_22 = arith.constant 0 : index
    %c0_23 = arith.constant 0 : index
    %23 = vector.load %arg8[%c0_22, %c0_23] : memref<1x2xf32, #tpu.memory_space<vmem>>, vector<1x2xf32>
    %24 = vector.broadcast %23 : vector<1x2xf32> to vector<8x2xf32>
    %25 = arith.addf %22, %24 : vector<8x2xf32>
    %26 = arith.mulf %25, %25 : vector<8x2xf32>
    %cst_24 = arith.constant dense<0.000000e+00> : vector<8xf32>
    %27 = vector.multi_reduction <add>, %26, %cst_24 [1] : vector<8x2xf32> to vector<8xf32>
    %28 = vector.shape_cast %27 : vector<8xf32> to vector<8x1xf32>
    %cst_25 = arith.constant 9.99999982E-15 : f32
    %29 = vector.broadcast %cst_25 : f32 to vector<8x1xf32>
    %30 = arith.maximumf %28, %29 : vector<8x1xf32>
    %31 = math.rsqrt %30 : vector<8x1xf32>
    %32 = vector.broadcast %31 : vector<8x1xf32> to vector<8x2xf32>
    %33 = arith.mulf %25, %32 : vector<8x2xf32>
    %c0_26 = arith.constant 0 : index
    %c0_27 = arith.constant 0 : index
    %34 = vector.load %arg9[%c0_26, %c0_27] : memref<8x2xf32, #tpu.memory_space<vmem>>, vector<8x2xf32>
    tpu.vector_store %arg9[%c0_26, %c0_27], %33 {strides = array<i32>} : memref<8x2xf32, #tpu.memory_space<vmem>>, vector<8x2xf32>,
    return
  }
  func.func @transform_0(%arg0: i32) -> (i32, i32) {
    %c0_i32 = arith.constant 0 : i32
    %c0_i32_0 = arith.constant 0 : i32
    return %arg0, %c0_i32 : i32, i32
  }
  func.func @transform_1(%arg0: i32) -> (i32, i32) {
    %c0_i32 = arith.constant 0 : i32
    %c0_i32_0 = arith.constant 0 : i32
    return %arg0, %c0_i32 : i32, i32
  }
  func.func @transform_2(%arg0: i32) -> (i32, i32) {
    %c0_i32 = arith.constant 0 : i32
    %c0_i32_0 = arith.constant 0 : i32
    %c0_i32_1 = arith.constant 0 : i32
    return %c0_i32, %c0_i32_0 : i32, i32
  }
  func.func @transform_3(%arg0: i32) -> (i32, i32) {
    %c0_i32 = arith.constant 0 : i32
    %c0_i32_0 = arith.constant 0 : i32
    %c0_i32_1 = arith.constant 0 : i32
    return %c0_i32, %c0_i32_0 : i32, i32
  }
  func.func @transform_4(%arg0: i32) -> (i32, i32) {
    %c0_i32 = arith.constant 0 : i32
    %c0_i32_0 = arith.constant 0 : i32
    %c0_i32_1 = arith.constant 0 : i32
    return %c0_i32, %c0_i32_0 : i32, i32
  }
  func.func @transform_5(%arg0: i32) -> (i32, i32) {
    %c0_i32 = arith.constant 0 : i32
    %c0_i32_0 = arith.constant 0 : i32
    %c0_i32_1 = arith.constant 0 : i32
    return %c0_i32, %c0_i32_0 : i32, i32
  }
  func.func @transform_6(%arg0: i32) -> (i32, i32) {
    %c0_i32 = arith.constant 0 : i32
    %c0_i32_0 = arith.constant 0 : i32
    %c0_i32_1 = arith.constant 0 : i32
    return %c0_i32, %c0_i32_0 : i32, i32
  }
  func.func @transform_7(%arg0: i32) -> (i32, i32) {
    %c0_i32 = arith.constant 0 : i32
    %c0_i32_0 = arith.constant 0 : i32
    %c0_i32_1 = arith.constant 0 : i32
    return %c0_i32, %c0_i32_0 : i32, i32
  }
  func.func @transform_8(%arg0: i32) -> (i32, i32) {
    %c0_i32 = arith.constant 0 : i32
    %c0_i32_0 = arith.constant 0 : i32
    return %arg0, %c0_i32 : i32, i32
  }
}

</mosaic_0001>

<bundles_post_ra>
// kernel: tpu_custom_call.1
= control target key start
LH: loop header
LB: loop body
LE: loop exit
PB: predicated region body
PF: predicated region fallthrough
CT: control target
= control target key end

     0   :  { %13 = vsyncpa [#allocation4], 0  ;;  %s621_s27 = smov [#allocation3]   ;;  %s751_s0 = inlined_call_operand.vmem [shape: bf16[8,32], index: 0, kind: input, shape index: {}]   ;;  %s752_s1 = inlined_call_operand.vmem [shape: bf16[8,32], index: 1, kind: input, shape index: {}]   ;;  %s753_s2 = inlined_call_operand.vmem [shape: bf16[64,256], index: 2, kind: input, shape index: {}]   ;;  %s754_s3 = inlined_call_operand.vmem [shape: f32[1,256], index: 3, kind: input, shape index: {}]   ;;  %s755_s4 = inlined_call_operand.hbm [shape: bf16[256,128], index: 4, kind: input, shape index: {}]   ;;  %s756_s5 = inlined_call_operand.vmem [shape: f32[1,128], index: 5, kind: input, shape index: {}]   ;;  %s757_s6 = inlined_call_operand.vmem [shape: bf16[128,2], index: 6, kind: input, shape index: {}]   ;;  %s758_s7 = inlined_call_operand.vmem [shape: f32[1,2], index: 7, kind: input, shape index: {}]   ;;  %s759_s8 = inlined_call_operand.vmem [shape: f32[8,2], index: 8, kind: output, shape index: {}]  }
   0x1   :  { %s27_s28 = sshll.u32 %s621_s27, 4  ;;  %s597_s9 = scalar_lea.hbm %s755_s4, 2048  ;;  %s28_s28 = int_to_ptr.vmem [resolvable:$true] %s27_s28 }
   0x2   :  { %p598_p0 = scmp.ne.s32.totalorder %s755_s4, %s597_s9  ;;  %p601_p1 = scmp.lt.u32.totalorder %s597_s9, %s755_s4 }
   0x4   :  { %p603_p2 = pnand %p601_p1, %p598_p0 }
   0x6   :  { %606 = shalt.err (!%p603_p2)
}
   0x7   :  { %s607_s14 = scalar_lea.vmem %s28_s28, 2048  ;;  %p612_p4 = scmp.lt.s32.totalorder %s28_s28, %s28_s28 }
   0x8   :  { %p608_p3 = scmp.ne.s32.totalorder %s28_s28, %s607_s14  ;;  %p613_p5 = scmp.lt.s32.totalorder %s607_s14, %s607_s14 }
   0xa   :  { %p614_p6 = por %p613_p5, %p612_p4 }
   0xc   :  { %p615_p7 = pnand %p614_p6, %p608_p3 }
   0xe   :  { %618 = shalt.err (!%p615_p7)
}
   0xf   :  { %s622_s15 = smov 64   ;;  %s623_s16 = smov 4  }
  0x10   :  { %33 = dma.hbm_to_vmem [thread:$0]  %s755_s4, 2048, %s28_s28, [#allocation4], %s622_s15, %s622_s15, %s623_s16  }
  0x11   :  { %619 = dma.done.wait [#allocation4], 2048  }
  0x12   :  { %620 = vsyncadd [#allocation4], 4294965248  ;;  %v624_v0 = vmov 0   ;;  %v47_v1 = vld [vmem:[%s752_s1] sm:$0xf]  ;;  %s625_s21 = smov 32   ;;  %v65_v36 = vlaneseq }
  0x13   :  { %151 = vmatprep.mubr.bf16.mxu0 %v624_v0  ;;  %49 = vrot.lane.b32.xlu0 %v47_v1, %s625_s21  ;;  %v559_v2 = vld [vmem:[%s753_s2 + $0x4] ss:$8 sps:$4 sm:$0xff]   ;;  %v561_v3 = vld [vmem:[%s753_s2] ss:$8 sps:$4 sm:$0xff]   ;;  %vm45_vm0 = vcmask 257024   ;;  %v575_v14 = vld [vmem:[#allocation3 + $0x50] sm:$0xff]  }
  0x14   :  { %v562_v4 = vld [vmem:[%s753_s2 + $0x14] ss:$8 sps:$4 sm:$0xff]   ;;  %119 = vmatprep.subr.bf16.mxu0 %v559_v2  ;;  %v44_v5 = vld [vmem:[%s751_s0] sm:$0xf]  ;;  %v564_v6 = vld [vmem:[%s753_s2 + $0x10] ss:$8 sps:$4 sm:$0xff]  }
  0x15   :  { %120 = vmatpush1.bf16.msra.mxu0 %v561_v3  ;;  %46 = vst.msk [vmem:[#allocation2] sm:$0xf] %vm45_vm0, %v44_v5  ;;  %v565_v7 = vld [vmem:[%s753_s2 + $0x24] ss:$8 sps:$4 sm:$0xff]   ;;  %v567_v8 = vld [vmem:[%s753_s2 + $0x20] ss:$8 sps:$4 sm:$0xff]  }
  0x16   :  { %121 = vmatprep.subr.bf16.mxu0 %v562_v4  ;;  %v571_v9 = vld [vmem:[#allocation3 + $0x40] sm:$0xff]   ;;  %v568_v10 = vld [vmem:[%s753_s2 + $0x34] ss:$8 sps:$4 sm:$0xff]   ;;  %v573_v12 = vld [vmem:[#allocation3 + $0x48] sm:$0xff]   ;;  %vm52_vm1 = vcmask 519424   ;;  %vm115_vm2 = vcmask 523264  }
  0x17   :  { %v572_v11 = vld [vmem:[#allocation3] sm:$0xff]   ;;  %501 = vmatprep.subr.bf16.mxu1 %v571_v9  ;;  %v574_v13 = vld [vmem:[#allocation3 + $0x8] sm:$0xff]   ;;  %v576_v16 = vld [vmem:[#allocation3 + $0x10] sm:$0xff]   ;;  %v626_v30 = vmov 0.0   ;;  %v66_v37 = vshrl.u32 %v65_v36, 7  ;;  %vm627_vm3 = vmmov 0  }
  0x18   :  { %502 = vmatpush3.bf16.msra.mxu1 %v572_v11  ;;  %v570_v15 = vld [vmem:[%s753_s2 + $0x30] ss:$8 sps:$4 sm:$0xff]   ;;  %v577_v17 = vld [vmem:[#allocation3 + $0x58] sm:$0xff]   ;;  %v579_v19 = vld [vmem:[#allocation3 + $0x60] sm:$0xff]   ;;  %vm453_vm4 = vcmask 15360  }
  0x19   :  { %122 = vmatpush1.bf16.msra.mxu0 %v564_v6  ;;  %503 = vmatprep.subr.bf16.mxu1 %v573_v12  ;;  %v578_v18 = vld [vmem:[#allocation3 + $0x18] sm:$0xff]   ;;  %v580_v20 = vld [vmem:[#allocation3 + $0x20] sm:$0xff]   ;;  %v581_v21 = vld [vmem:[#allocation3 + $0x68] sm:$0xff]   ;;  %v67_v38 = vsub.s32 0, %v66_v37  ;;  %v71_v40 = vsub.s32 1, %v66_v37 }
  0x1a   :  { %123 = vmatprep.subr.bf16.mxu0 %v565_v7  ;;  %v582_v22 = vld [vmem:[#allocation3 + $0x28] sm:$0xff]   ;;  %v583_v25 = vld [vmem:[#allocation3 + $0x70] sm:$0xff]   ;;  %v585_v27 = vld [vmem:[#allocation3 + $0x78] sm:$0xff]  }
  0x1b   :  { %v584_v26 = vld [vmem:[#allocation3 + $0x30] sm:$0xff]   ;;  %v586_v28 = vld [vmem:[#allocation3 + $0x38] sm:$0xff]   ;;  %v588_v31 = vld [vmem:[%s757_s6 + $0x8] sm:$0xff]  }
  0x1c   :  { %504 = vmatpush3.bf16.msra.mxu1 %v574_v13  ;;  %v587_v29 = vld [vmem:[%s757_s6] sm:$0xff]   ;;  %v589_v32 = vld [vmem:[%s757_s6 + $0x10] sm:$0xff]   ;;  %v590_v33 = vld [vmem:[%s757_s6 + $0x18] sm:$0xff]  }
  0x1d   :  { %124 = vmatpush1.bf16.msra.mxu0 %v567_v8  ;;  %505 = vmatprep.subr.bf16.mxu1 %v575_v14  ;;  %v591_v34 = vld [vmem:[%s757_s6 + $0x20] sm:$0xff]   ;;  %v592_v35 = vld [vmem:[%s757_s6 + $0x28] sm:$0xff]   ;;  %v593_v53 = vld [vmem:[%s757_s6 + $0x30] sm:$0xff]  }
  0x1e   :  { %125 = vmatprep.subr.bf16.mxu0 %v568_v10  ;;  %v63_v39 = vld [vmem:[%s754_s3] sm:$0x3]  ;;  %v594_v54 = vld [vmem:[%s757_s6 + $0x38] sm:$0xff]  }
  0x1f   :  { %v68_v41 = vrot.slane %v63_v39, %v67_v38  ;;  %v72_v42 = vrot.slane %v63_v39, %v71_v40  ;;  %v475_v56 = vld [vmem:[%s756_s5] ss:$0 sm:$0xff] }
  0x20   :  { %506 = vmatpush3.bf16.msra.mxu1 %v576_v16  ;;  %v492_v0 = vld [vmem:[%s758_s7] ss:$0 sm:$0xff] }
  0x21   :  { %126 = vmatpush1.bf16.msra.mxu0 %v570_v15  ;;  %507 = vmatprep.subr.bf16.mxu1 %v577_v17 }
  0x22   :  { %532 = vmatprep.subr.bf16.mxu0 %v626_v30 }
  0x24   :  { %508 = vmatpush3.bf16.msra.mxu1 %v578_v18 }
  0x25   :  { %509 = vmatprep.subr.bf16.mxu1 %v579_v19 }
  0x28   :  { %510 = vmatpush3.bf16.msra.mxu1 %v580_v20 }
  0x29   :  { %511 = vmatprep.subr.bf16.mxu1 %v581_v21 }
  0x2c   :  { %512 = vmatpush3.bf16.msra.mxu1 %v582_v22 }
  0x2d   :  { %513 = vmatprep.subr.bf16.mxu1 %v583_v25 }
  0x30   :  { %514 = vmatpush3.bf16.msra.mxu1 %v584_v26 }
  0x31   :  { %515 = vmatprep.subr.bf16.mxu1 %v585_v27 }
  0x34   :  { %516 = vmatpush3.bf16.msra.mxu1 %v586_v28 }
  0x85   :  { %v50_v23 = vpop.permute.xlu0 %49 }
  0x86   :  { %53 = vst.msk [vmem:[#allocation2] sm:$0xf] %vm52_vm1, %v50_v23 }
  0x8d   :  { %v54_v24 = vld [vmem:[#allocation2] sm:$0xf] }
  0x8e   :  { %474 = vmatmul.mubr.msk.bf16.vlgmr.msra.gmra.mrb[0].mxu0 %vm115_vm2, %v54_v24 }
  0x8f   :  { %533 = vmatpush3.bf16.msra.mxu0 %v587_v29  ;;  %548 = vmatprep.mubr.msk.bf16.mxu0 %vm627_vm3, %v626_v30 }
  0x90   :  { %534 = vmatprep.subr.bf16.mxu0 %v626_v30 }
  0x93   :  { %535 = vmatpush3.bf16.msra.mxu0 %v588_v31 }
  0x94   :  { %536 = vmatprep.subr.bf16.mxu0 %v626_v30 }
  0x97   :  { %537 = vmatpush3.bf16.msra.mxu0 %v589_v32 }
  0x98   :  { %538 = vmatprep.subr.bf16.mxu0 %v626_v30 }
  0x9b   :  { %539 = vmatpush3.bf16.msra.mxu0 %v590_v33 }
  0x9c   :  { %540 = vmatprep.subr.bf16.mxu0 %v626_v30 }
  0x9f   :  { %541 = vmatpush3.bf16.msra.mxu0 %v591_v34 }
  0xa0   :  { %542 = vmatprep.subr.bf16.mxu0 %v626_v30 }
  0xa3   :  { %543 = vmatpush3.bf16.msra.mxu0 %v592_v35 }
  0xa4   :  { %544 = vmatprep.subr.bf16.mxu0 %v626_v30 }
  0xa7   :  { %545 = vmatpush3.bf16.msra.mxu0 %v593_v53 }
  0xa8   :  { %546 = vmatprep.subr.bf16.mxu0 %v626_v30 }
  0xab   :  { %547 = vmatpush3.bf16.msra.mxu0 %v594_v54 }
 0x161   :  { %v153_v43 = vpop.f32.mrb[0].mxu0 }
 0x162   :  { %v154_v44 = vadd.f32 %v153_v43, %v68_v41  ;;  %v155_v45 = vpop.f32.mrb[1].mxu0 }
 0x163   :  { %v156_v46 = vadd.f32 %v155_v45, %v72_v42  ;;  %v157_v47 = vpop.f32.mrb[2].mxu0 }
 0x164   :  { %v160_v48 = vmax.f32 %v154_v44, 0.0  ;;  %v158_v49 = vpop.f32.mrb[3].mxu0 }
 0x165   :  { %v161_v50 = vmax.f32 %v156_v46, 0.0 }
 0x166   :  { %v162_v52 = vpack.c.bf16 %v160_v48, %v160_v48 }
 0x167   :  { %v163_v51 = vpack.c.bf16 %v161_v50, %v161_v50 }
 0x169   :  { %331 = vmatprep.mubr.bf16.mxu1 %v163_v51 }
 0x16a   :  { %332 = vmatmul.mubr.bf16.vlgmr.msra.gmra.mrb[0].mxu1 %v162_v52 }
 0x23d   :  { %v517_v55 = vpop.f32.mrb[0].mxu1 }
 0x23e   :  { %v518_v57 = vpop.f32.mrb[1].mxu1 }
 0x23f   :  { %v519_v58 = vadd.f32 %v518_v57, %v517_v55  ;;  %v520_v59 = vpop.f32.mrb[2].mxu1 }
 0x240   :  { %v521_v60 = vpop.f32.mrb[3].mxu1 }
 0x241   :  { %v334_v61 = vadd.f32 %v519_v58, %v475_v56 }
 0x243   :  { %v339_v62 = vmax.f32 %v334_v61, 0.0 }
 0x245   :  { %v340_v63 = vpack.c.bf16 %v339_v62, %v339_v62 }
 0x247   :  { %549 = vmatmul.mubr.bf16.vlgmr.msra.gmra.mrb[4].mxu0 %v340_v63 }
 0x31a   :  { %v446_v1 = vpop.f32.mrb[4].mxu0 }
 0x31b   :  { %v447_v2 = vadd.f32 %v492_v0, %v446_v1  ;;  %v550_v3 = vpop.f32.mrb[5].mxu0 }
 0x31c   :  { %v449_v4 = vpop.f32.mrb[6].mxu0 }
 0x31d   :  { %v551_v5 = vpop.f32.mrb[7].mxu0  ;;  %v452_v6 = vmul.f32 %v447_v2, %v447_v2 }
 0x31f   :  { %v454_v7 = vsel %vm453_vm4, %v452_v6, 0.0 }
 0x320   :  { %455 = vadd.xlane.f32.xlu0 %v454_v7 }
 0x3ad   :  { %v456_v8 = vpop.xlane.xlu0 %455 }
 0x3ae   :  { %v457_v9 = vmax.f32 %v456_v8, 1e-14 }
 0x3b0   :  { %595 = vrsqrt.f32 %v457_v9 }
 0x3ba   :  { %v596_v10 = vpop.eup %595 }
 0x3bb   :  { %v459_v11 = vmul.f32 %v596_v10, %v447_v2 }
 0x3bd   :  { %460 = vst.msk [vmem:[%s759_s8] sm:$0xff] %vm453_vm4, %v459_v11 }
 0x3be   :  { %465 = vsyncpa [#allocation4], 1 }

</bundles_post_ra>
